<compile_context>
chip_gen: v7x
topology: tpu7x:2x2x1
jax: 0.10.0
libtpu: 0.0.40
codegen_flags: <defaults>
</compile_context>

<pallas_src>
import jax
import jax.numpy as jnp
from jax.experimental import pallas as pl
from jax.experimental.pallas import tpu as pltpu


_LANE = 128
_NUM_SPLITS = 2        # leading "parallel" grid axis: lets v7x shard rows across both TCs
_MAX_TILE_N = 65536    # lanes per tile: (5+1)*65536*4B ~ 1.5 MiB/tile, fits scoped VMEM
                       # on v5e/v6e/v7x with 2-deep buffering


def _round_up(x, m):
    return ((x + m - 1) // m) * m


def _expectation_loss_kernel(probs_ref, gts_ref, out_ref):
    # probs_ref: (C, TILE_N)  -- class axis on sublanes, batch axis lane-dense
    # gts_ref:   (1, TILE_N)
    # out_ref:   (8, 128) partial-sum block for this split; resident across the
    #            reduction axis, every element holds the same running sum.
    i = pl.program_id(1)

    @pl.when(i == 0)
    def _():
        out_ref[...] = jnp.zeros_like(out_ref)

    probs = probs_ref[...].astype(jnp.float32)           # (C, TILE_N)
    gts = gts_ref[...].astype(jnp.float32)               # (1, TILE_N)

    # class weights [1, 2, ..., C] per sublane row, broadcast along lanes
    w = (jax.lax.broadcasted_iota(jnp.int32, probs.shape, 0) + 1).astype(jnp.float32)

    # expectation = probs @ [1..C]  (contraction length 5 -> keep on VPU/XLU, not MXU)
    expectation = jnp.sum(probs * w, axis=0, keepdims=True)              # (1, TILE_N)
    partial = jnp.sum(jnp.abs(expectation - gts), axis=1, keepdims=True)  # (1, 1)

    out_ref[...] = out_ref[...] + partial   # broadcast-accumulate into the block


def expectation_loss(probs, gts):
    """probs: (N, C) float (C == 5); gts: (N,) float.

    Returns scalar f32 loss = mean(|probs @ [1..C] - gts|).
    """
    n, c = probs.shape

    # Lane-dense layout: batch axis last. Keep the input dtype (no host upcast).
    probs_t = probs.T                      # (C, N)
    gts_row = gts.reshape(1, n)            # (1, N)

    n128 = _round_up(n, _LANE)
    tile_n = min(_MAX_TILE_N, n128)
    total_tiles = _round_up(_round_up(n128, tile_n) // tile_n, _NUM_SPLITS)
    tiles_per_split = total_tiles // _NUM_SPLITS
    n_pad = total_tiles * tile_n

    # Zero padding: padded columns give |0 - 0| = 0 and do not change the sum.
    probs_t = jnp.pad(probs_t, ((0, 0), (0, n_pad - n)))
    gts_row = jnp.pad(gts_row, ((0, 0), (0, n_pad - n)))

    out = pl.pallas_call(
        _expectation_loss_kernel,
        out_shape=jax.ShapeDtypeStruct((8 * _NUM_SPLITS, _LANE), jnp.float32),
        grid=(_NUM_SPLITS, tiles_per_split),
        in_specs=[
            pl.BlockSpec((c, tile_n), lambda p, i: (0, p * tiles_per_split + i)),
            pl.BlockSpec((1, tile_n), lambda p, i: (0, p * tiles_per_split + i)),
        ],
        out_specs=pl.BlockSpec((8, _LANE), lambda p, i: (p, 0)),
        compiler_params=pltpu.CompilerParams(
            dimension_semantics=("parallel", "arbitrary")),
    )(probs_t, gts_row)

    # Combine the per-split partial sums and apply the L1 mean (divide by true N).
    partial_sums = out[::8, 0]             # one value per split
    return jnp.sum(partial_sums) * jnp.float32(1.0 / n)


if __name__ == "__main__":
    key = jax.random.PRNGKey(0)
    k1, k2 = jax.random.split(key)

    N, C = 8, 5
    # probs: softmax over 5 classes per row (class probabilities)
    logits = jax.random.normal(k1, (N, C), dtype=jnp.float32)
    probs = jax.nn.softmax(logits, axis=-1)
    # ground-truth expectations in [1, 5]
    gts = jax.random.uniform(k2, (N,), dtype=jnp.float32, minval=1.0, maxval=5.0)

    loss = expectation_loss(probs, gts)
    jax.block_until_ready(loss)

    # reference check in plain JAX
    cls_vec = jnp.arange(1.0, C + 1.0, dtype=jnp.float32)
    ref = jnp.mean(jnp.abs(probs @ cls_vec - gts))
    assert jnp.allclose(loss, ref, atol=1e-5, rtol=1e-5), (loss, ref)

    print("KERNEL_OK")
</pallas_src>

<mosaic_0001>
module attributes {stable_mosaic.version = 11 : i64} {
  func.func @_expectation_loss_kernel(%arg0: i32, %arg1: i32, %arg2: memref<5x128xf32, #tpu.memory_space<vmem>>, %arg3: memref<1x128xf32, #tpu.memory_space<vmem>>, %arg4: memref<8x128xf32, #tpu.memory_space<vmem>>) attributes {dimension_semantics = [#tpu.dimension_semantics<parallel>, #tpu.dimension_semantics<arbitrary>], iteration_bounds = array<i64: 2, 1>, scalar_prefetch = 0 : i64, scratch_operands = 0 : i64, tpu.core_type = #tpu.core_type<tc>, window_params = [{transform_indices = @transform_0, window_bounds = array<i64: 5, 128>}, {transform_indices = @transform_1, window_bounds = array<i64: 1, 128>}, {transform_indices = @transform_2, window_bounds = array<i64: 8, 128>}]} {
    %c0_i32 = arith.constant 0 : i32
    %0 = arith.cmpi eq, %arg1, %c0_i32 : i32
    %1 = arith.extui %0 : i1 to i32
    %c0_i32_0 = arith.constant 0 : i32
    %2 = arith.cmpi ne, %1, %c0_i32_0 : i32
    scf.if %2 {
      %cst_9 = arith.constant 0.000000e+00 : f32
      %20 = vector.broadcast %cst_9 : f32 to vector<8x128xf32>
      %c0_10 = arith.constant 0 : index
      %c0_11 = arith.constant 0 : index
      %21 = vector.load %arg4[%c0_10, %c0_11] : memref<8x128xf32, #tpu.memory_space<vmem>>, vector<8x128xf32>
      tpu.vector_store %arg4[%c0_10, %c0_11], %20 {strides = array<i32>} : memref<8x128xf32, #tpu.memory_space<vmem>>, vector<8x128xf32>,
    } else {
    }
    %c0 = arith.constant 0 : index
    %c0_1 = arith.constant 0 : index
    %3 = vector.load %arg2[%c0, %c0_1] : memref<5x128xf32, #tpu.memory_space<vmem>>, vector<5x128xf32>
    %c0_2 = arith.constant 0 : index
    %c0_3 = arith.constant 0 : index
    %4 = vector.load %arg3[%c0_2, %c0_3] : memref<1x128xf32, #tpu.memory_space<vmem>>, vector<1x128xf32>
    %5 = tpu.iota {dimensions = array<i32: 0>} : vector<5x128xi32>
    %c1_i32 = arith.constant 1 : i32
    %6 = vector.broadcast %c1_i32 : i32 to vector<5x128xi32>
    %7 = arith.addi %5, %6 : vector<5x128xi32>
    %8 = arith.sitofp %7 : vector<5x128xi32> to vector<5x128xf32>
    %9 = arith.mulf %3, %8 : vector<5x128xf32>
    %cst = arith.constant dense<0.000000e+00> : vector<128xf32>
    %10 = vector.multi_reduction <add>, %9, %cst [0] : vector<5x128xf32> to vector<128xf32>
    %11 = vector.shape_cast %10 : vector<128xf32> to vector<1x128xf32>
    %12 = arith.subf %11, %4 : vector<1x128xf32>
    %13 = math.absf %12 : vector<1x128xf32>
    %cst_4 = arith.constant dense<0.000000e+00> : vector<1xf32>
    %14 = vector.multi_reduction <add>, %13, %cst_4 [1] : vector<1x128xf32> to vector<1xf32>
    %15 = vector.shape_cast %14 : vector<1xf32> to vector<1x1xf32>
    %c0_5 = arith.constant 0 : index
    %c0_6 = arith.constant 0 : index
    %16 = vector.load %arg4[%c0_5, %c0_6] : memref<8x128xf32, #tpu.memory_space<vmem>>, vector<8x128xf32>
    %17 = vector.broadcast %15 : vector<1x1xf32> to vector<8x128xf32>
    %18 = arith.addf %16, %17 : vector<8x128xf32>
    %c0_7 = arith.constant 0 : index
    %c0_8 = arith.constant 0 : index
    %19 = vector.load %arg4[%c0_7, %c0_8] : memref<8x128xf32, #tpu.memory_space<vmem>>, vector<8x128xf32>
    tpu.vector_store %arg4[%c0_7, %c0_8], %18 {strides = array<i32>} : memref<8x128xf32, #tpu.memory_space<vmem>>, vector<8x128xf32>,
    return
  }
  func.func @transform_0(%arg0: i32, %arg1: i32) -> (i32, i32) {
    %c1_i32 = arith.constant 1 : i32
    %0 = arith.muli %arg0, %c1_i32 : i32
    %1 = arith.addi %0, %arg1 : i32
    %c0_i32 = arith.constant 0 : i32
    %c0_i32_0 = arith.constant 0 : i32
    return %c0_i32, %1 : i32, i32
  }
  func.func @transform_1(%arg0: i32, %arg1: i32) -> (i32, i32) {
    %c1_i32 = arith.constant 1 : i32
    %0 = arith.muli %arg0, %c1_i32 : i32
    %1 = arith.addi %0, %arg1 : i32
    %c0_i32 = arith.constant 0 : i32
    %c0_i32_0 = arith.constant 0 : i32
    return %c0_i32, %1 : i32, i32
  }
  func.func @transform_2(%arg0: i32, %arg1: i32) -> (i32, i32) {
    %c0_i32 = arith.constant 0 : i32
    %c0_i32_0 = arith.constant 0 : i32
    return %arg0, %c0_i32 : i32, i32
  }
}

</mosaic_0001>

<bundles_post_ra>
// kernel: tpu_custom_call.1
= control target key start
LH: loop header
LB: loop body
LE: loop exit
PB: predicated region body
PF: predicated region fallthrough
CT: control target
= control target key end

     0   :  { %7 = vsyncpa [#allocation3], 0  ;;  %s719_s0 = inlined_call_operand.hbm [shape: f32[5,256], index: 0, kind: input, shape index: {}]   ;;  %s720_s1 = inlined_call_operand.vmem [shape: f32[1,256], index: 1, kind: input, shape index: {}]   ;;  %s721_s2 = inlined_call_operand.hbm [shape: f32[16,128], index: 2, kind: output, shape index: {}]  }
   0x1   :  { %9 = vsyncpa [#allocation3 + $0x1], 0 }
   0x2   :  { %10 = vsyncpa [#allocation4], 0 }
   0x3   :  { %12 = vsyncpa [#allocation4 + $0x1], 0  ;;  %s538_s9 = smov 0   ;;  %s540_s10 = smov 0  }
   0x4   :  { %s542_s11 = smov 0   ;;  %s544_s12 = smov 0  }
   0x5   :  { %s546_s13 = smov 0   ;;  %s548_s14 = smov 0  }
   0x6 LB: > { %s331_s15 = sadd.s32 4294967295, %s519_s14   ;;  %s332_s16 = sadd.s32 4294967294, %s519_s14   ;;  %s519_s14 = sphi %s548_s14, %s18_s14   ;;  %s515_s13 = sphi %s546_s13, %s737_s13   ;;  %s511_s12 = sphi %s544_s12, %s736_s12   ;;  %s507_s11 = sphi %s542_s11, %s735_s11   ;;  %s503_s10 = sphi %s540_s10, %s734_s10   ;;  %s499_s9 = sphi %s538_s9, %s733_s9  }
   0x7   : > { %s30_s17 = sadd.s32 1, %s515_s13  ;;  %s39_s18 = sadd.s32 1, %s507_s11 }
   0x8   : > { %p32_p0 = scmp.ge.s32.totalorder %s30_s17, 2  ;;  %p46_p1 = scmp.ne.s32.totalorder %s507_s11, %s503_s10 }
   0x9   : > { %p47_p2 = scmp.eq.s32.totalorder %s519_s14, 0  ;;  %p52_p3 = scmp.ne.s32.totalorder %s503_s10, %s499_s9 }
   0xa   : > { %s739_s17 = smov (%p32_p0, %s30_s17), 0  ;;  %p53_p5 = scmp.eq.s32.totalorder %s331_s15, 0 }
   0xb   : > { %p579_p4 = por %p47_p2, %p46_p1  ;;  %s36_s20 = ssub.s32 %s515_s13, %s739_s17 }
   0xc   : > { %p104_p6 = scmp.eq.s32.totalorder %s331_s15, 1  ;;  %p37_p7 = scmp.eq.s32.totalorder %s36_s20, 0 }
   0xd   : > { %p585_p8 = por %p53_p5, %p52_p3  ;;  %p110_p10 = scmp.eq.s32.totalorder %s332_s16, 1 }
   0xe   : > { %p589_p9 = por %p104_p6, %p46_p1  ;;  %p356_p13 = scmp.lt.s32.totalorder %s519_s14, 2 }
   0xf   : > { %s594_s23 = scalar_select %p37_p7, %s507_s11, %s39_s18  }
  0x10   : > { %s725_s22 = scalar_select %p589_p9, 1, 0 }
  0x11   : > { %p596_p11 = por %p110_p10, %p52_p3  ;;  %s130_s25 = sand.u32 1, %s507_s11  }
  0x12   : > { %s335_s26 = sshll.u32 %s130_s25, 3  ;;  %s336_s27 = sshll.u32 %s515_s13, 7 }
  0x13   : > { %s726_s24 = scalar_select %p596_p11, 1, 0 }
  0x14   : > { %s607_s30 = scalar_lea.hbm %s719_s0, %s336_s27  ;;  %s134_s3 = scalar_lea.vmem [#allocation2], %s335_s26 }
  0x15   : > { %s142_s4 = sshll.u32 %s134_s3, 4  ;;  %p613_p0 = pnand %p356_p13, %p579_p4  ;;  %s609_s4 = int_to_ptr.vmem [resolvable:$true] %s142_s4 }
  0x16   : > { %s131_s6 = scalar_lea.sflag [#allocation3], %s130_s25  ;;  %s407_s7 = scalar_lea.hbm %s607_s30, 128 }
  0x17   : > { %p408_p3 = scmp.ne.s32.totalorder %s607_s30, %s407_s7  ;;  %p409_p5 = pneg %p613_p0 }
  0x18   : > { %s412_s16 = scalar_lea.hbm %s719_s0, 256  ;;  %p413_p4 = scmp.lt.u32.totalorder %s607_s30, %s719_s0 }
  0x19   : > { %p410_p6 = pnand %p409_p5, %p408_p3  ;;  %p414_p10 = scmp.lt.u32.totalorder %s412_s16, %s407_s7 }
  0x1a   : > { %p416_p12 = scmp.lt.u32.totalorder %s407_s7, %s607_s30 }
  0x1b   : > { %p411_p7 = pneg %p410_p6  ;;  %p415_p13 = por %p414_p10, %p413_p4 }
  0x1d   : > { %p417_p1 = por %p416_p12, %p415_p13 }
  0x1f   : > { %p418_p2 = pnand %p417_p1, %p411_p7 }
  0x21   : > { %421 = shalt.err (!%p418_p2)
}
  0x22   : > { %s422_s20 = scalar_lea.vmem %s609_s4, 128  ;;  %s521_s25 = smov [#allocation2]  }
  0x23   : > { %p423_p3 = scmp.ne.s32.totalorder %s609_s4, %s422_s20  ;;  %s427_s26 = sshll.u32 %s521_s25, 4  ;;  %s428_s26 = int_to_ptr.vmem [resolvable:$false] %s427_s26 }
  0x24   : > { %s429_s27 = scalar_lea.vmem %s428_s26, 256  ;;  %p430_p9 = scmp.lt.s32.totalorder %s609_s4, %s428_s26 }
  0x25   : > { %p425_p6 = pnand %p423_p3, %p409_p5  ;;  %p431_p4 = scmp.lt.s32.totalorder %s429_s27, %s422_s20 }
  0x27   : > { %p426_p11 = pneg %p425_p6  ;;  %p432_p10 = por %p431_p4, %p430_p9 }
  0x29   : > { %p433_p12 = pnand %p432_p10, %p426_p11 }
  0x2b   : > { %436 = shalt.err (!%p433_p12)
}
  0x2c   : > { %351 = dma.hbm_to_vmem [thread:$0]  (!%p613_p0), %s607_s30, 128, %s609_s4, %s131_s6  }
  0x2d   : > { %p728_p1 = scmp.lt.s32.totalorder %s519_s14, 3  ;;  %p729_p2 = scmp.ge.s32.totalorder %s519_s14, 1 }
  0x2f   : > { %p156_p5 = pnand %p729_p2, %p728_p1 }
  0x30   : > { %s649_s28 = sand.u32 (!%p156_p5), 1, %s503_s10  }
  0x31   : > { %159 = sbr.rel (%p156_p5) target bundleno = 243 (0xf3), region = 28  ;;  %s338_s29 = sshll.u32 (!%p156_p5), %s649_s28, 3 }
  0x32   : > { %s162_s3 = scalar_lea.sflag (!%p156_p5), [#allocation3], %s649_s28  ;;  %s165_s5 = scalar_lea.vmem (!%p156_p5), [#allocation2], %s338_s29 }
  0x38   : > { %490 = dma.done.wait (%p585_p8), %s162_s3, 128  }
  0x39   : > { %492 = vsyncadd (%p585_p8), %s162_s3, 4294967168  ;;  %v203_v0 = vlaneseq  ;;  %v201_v4 = vld [vmem:[%s165_s5] sm:$0x1f]  ;;  %vm208_vm0 = vcmask 1044480   ;;  %p192_p9 = scmp.lt.s32.totalorder %s511_s12, 1  ;;  %vm218_vm1 = vcmask 1040384  }
  0x3a   : > { %s341_s7 = sshll.u32 %s511_s12, 7  ;;  %s189_s8 = scalar_lea.vmem [#allocation5], %s338_s29 }
  0x3b   : > { %v204_v1 = vshrl.u32 %v203_v0, 7  ;;  %s193_s30 = scalar_select %p192_p9, %s511_s12, 1 }
  0x3c   : > { %s243_s15 = sshll.u32 %s189_s8, 4  ;;  %s670_s19 = scalar_lea.hbm %s721_s2, %s341_s7  ;;  %s672_s15 = int_to_ptr.vmem [resolvable:$true] %s243_s15 }
  0x3d   : > { %v205_v2 = vadd.s32 1, %v204_v1  ;;  %s194_s6 = scalar_lea.vmem %s720_s1, %s193_s30  ;;  %v225_v17 = vsub.s32 0, %v204_v1  ;;  %s230_s20 = scalar_lea.sflag [#allocation4], %s649_s28 }
  0x3e   : > { %v202_v12 = vld [vmem:[%s194_s6] sm:$0x1]  ;;  %s437_s25 = scalar_lea.vmem %s672_s15, 128  ;;  %p730_p11 = scmp.ne.s32.totalorder %s725_s22, 0 }
  0x3f   : > { %v206_v3 = vcvt.s32.f32 %v205_v2  ;;  %p438_p8 = scmp.ne.s32.totalorder %s672_s15, %s437_s25  ;;  %s522_s12 = smov [#allocation5]  }
  0x40   : > { %s441_s26 = sshll.u32 %s522_s12, 4  ;;  %s442_s26 = int_to_ptr.vmem [resolvable:$false] %s441_s26 }
  0x41   : > { %v207_v5 = vmul.f32 %v206_v3, %v201_v4  ;;  %p439_p0 = pnand %p438_p8, %p730_p11  ;;  %s443_s27 = scalar_lea.vmem %s442_s26, 256 }
  0x42   : > { %p444_p13 = scmp.lt.s32.totalorder %s672_s15, %s442_s26  ;;  %p445_p3 = scmp.lt.s32.totalorder %s443_s27, %s437_s25 }
  0x43   : > { %v209_v6 = vsel %vm208_vm0, %v207_v5, 0.0  ;;  %p440_p7 = pneg %p439_p0 }
  0x44   : > { %v210_v7 = vrot.slane %v209_v6, 4  ;;  %p446_p6 = por %p445_p3, %p444_p13 }
  0x46   : > { %v211_v8 = vadd.f32 %v210_v7, %v209_v6  ;;  %p447_p4 = pnand %p446_p6, %p440_p7 }
  0x48   : > { %v212_v9 = vrot.slane %v211_v8, 2 }
  0x4a   : > { %v213_v10 = vadd.f32 %v212_v9, %v211_v8 }
  0x4c   : > { %v214_v11 = vrot.slane %v213_v10, 1 }
  0x4e   : > { %v215_v13 = vadd.f32 %v214_v11, %v213_v10 }
  0x50   : > { %v216_v14 = vsub.f32 %v215_v13, %v202_v12 }
  0x52   : > { %v217_v15 = vand.u32 2147483647, %v216_v14 }
  0x54   : > { %v219_v16 = vsel %vm218_vm1, %v217_v15, 0.0 }
  0x55   : > { %220 = vadd.xlane.f32.xlu0 %v219_v16 }
  0xe2   : > { %v221_v18 = vpop.xlane.xlu0 %220 }
  0xe3   : > { %v226_v19 = vrot.slane %v221_v18, %v225_v17 }
  0xe5   : > { %228 = vst [vmem:[%s189_s8] sm:$0xff] %v226_v19 }
  0xe6   : > { %450 = shalt.err (!%p447_p4)
}
  0xe7   : > { %s451_s28 = scalar_lea.hbm %s670_s19, 128  ;;  %s455_s5 = scalar_lea.hbm %s721_s2, 256 }
  0xe8   : > { %p452_p10 = scmp.ne.s32.totalorder %s670_s19, %s451_s28  ;;  %p456_p2 = scmp.lt.u32.totalorder %s670_s19, %s721_s2 }
  0xe9   : > { %p457_p5 = scmp.lt.u32.totalorder %s455_s5, %s451_s28  ;;  %p459_p8 = scmp.lt.u32.totalorder %s451_s28, %s670_s19 }
  0xea   : > { %p453_p12 = pnand %p452_p10, %p730_p11 }
  0xeb   : > { %p458_p9 = por %p457_p5, %p456_p2 }
  0xec   : > { %p454_p1 = pneg %p453_p12 }
  0xed   : > { %p460_p0 = por %p459_p8, %p458_p9 }
  0xef   : > { %p461_p7 = pnand %p460_p0, %p454_p1 }
  0xf1   : > { %464 = shalt.err (!%p461_p7)
}
  0xf2   : > { %346 = dma.vmem_to_hbm [thread:$0]  (%p730_p11), %s672_s15, 128, %s670_s19, %s230_s20  }
  0xf3 PF: > { %s255_s21 = sand.u32 1, %s499_s9   ;;  %p731_p13 = scmp.ne.s32.totalorder %s726_s24, 0 }
  0xf4   : > { %p732_p3 = scmp.ge.s32.totalorder %s519_s14, 2  ;;  %s256_s6 = scalar_lea.sflag [#allocation4], %s255_s21 }
  0xf6   : > { %p353_p6 = pnand %p732_p3, %p731_p13 }
  0xf8   : > { %494 = dma.done.wait (!%p353_p6), %s256_s6, 128  }
  0xf9   : > { %496 = vsyncadd (!%p353_p6), %s256_s6, 4294967168  ;;  %s18_s14 = sadd.s32 1, %s519_s14   ;;  %s733_s9 = smov %s503_s10 }
  0xfa   : > { %p15_p4 = scmp.ge.s32.totalorder %s18_s14, 4   ;;  %s734_s10 = smov %s507_s11 }
  0xfb   : > { %s735_s11 = smov %s594_s23  ;;  %s736_s12 = smov %s515_s13 }
  0xfc   : > { %s737_s13 = smov %s739_s17  ;;  %17 = sbr.rel (!%p15_p4) target bundleno = 6 (0x6), region = 80 }
 0x103   :  { %261 = vsyncpa [#allocation3], 1 }
 0x104   :  { %263 = vsyncpa [#allocation3 + $0x1], 1 }
 0x105   :  { %264 = vsyncpa [#allocation4], 1 }
 0x106   :  { %266 = vsyncpa [#allocation4 + $0x1], 1 }

</bundles_post_ra>
